<compile_context>
chip_gen: v6e
topology: v6e:2x2x1
jax: 0.10.0
libtpu: 0.0.40
codegen_flags: <defaults>
</compile_context>

<pallas_src>
import jax
import jax.numpy as jnp
from jax.experimental import pallas as pl
from jax.experimental.pallas import tpu as pltpu

ENC_CHANNELS = 1280  # efficientnet_b0 feature width (stand-in projection)

_LANES = 128
_SUBLANES = 8
_TILE_UNIT = _LANES * _SUBLANES   # 1024 pixels = one fully dense (8,128) f32 tile
_MAX_TILE = 256 * 1024            # pixels / grid step: ~3 MiB input DMA, ~8 MiB dbl-buffered VMEM
_MIN_TILE = 32 * 1024             # below this, per-step overhead starts to show


def _choose_tiling(hw):
    """Return (hw_padded, hw_tile).

    hw_padded is hw rounded up to a multiple of hw_tile; hw_tile is a multiple
    of 1024 pixels (so the repacked (8, hw_tile/8) block is sublane+lane dense)
    and sized from the real VMEM footprint (no sublane padding in this layout).
    """
    hw_pad = -(-hw // _TILE_UNIT) * _TILE_UNIT
    if hw_pad <= _MAX_TILE:
        return hw_pad, hw_pad                       # single full-extent tile per batch
    n_units = hw_pad // _TILE_UNIT
    max_units = _MAX_TILE // _TILE_UNIT
    min_units = _MIN_TILE // _TILE_UNIT
    # Largest divisor of n_units that fits the cap -> zero extra padding.
    for d in range(max_units, 0, -1):
        if n_units % d == 0 and d >= min_units:
            return hw_pad, d * _TILE_UNIT
    # Pathological pixel counts: take the max tile and pad the tail.
    hw_pad = -(-hw // _MAX_TILE) * _MAX_TILE
    return hw_pad, _MAX_TILE


# ----------------------------------------------------------------------------
# Fused normalise + collapsed encoder/head channel reduction.
#   wb_ref   : SMEM (4,)                  [w_s0, w_s1, w_s2, c_bias]
#   x_ref    : VMEM (1, 3, 8, hw8_tile)   raw pixels, sublane+lane dense
#   cam_ref  : VMEM (1, 8, hw8_tile)      relu(cam_raw) tile (dense store)
#   psum_ref : VMEM (1, 1, 1, 1)          partial sum of pre-ReLU cam for this (b, tile)
# ----------------------------------------------------------------------------
def cam_kernel(wb_ref, x_ref, cam_ref, psum_ref):
    x = x_ref[0]                                        # (3, 8, hw8_tile)
    cam_raw = (x[0] * wb_ref[0]
               + x[1] * wb_ref[1]
               + x[2] * wb_ref[2]
               + wb_ref[3])                             # (8, hw8_tile): 3 VPU FMAs
    cam_ref[...] = jnp.maximum(cam_raw, 0.0).reshape(cam_ref.shape)
    psum_ref[...] = jnp.sum(cam_raw).reshape(psum_ref.shape)


def net_forward(x_nchw, cancer, params):
    """Forward pass mirroring Net.forward (inference + loss outputs)."""
    mean, std, w_enc, w_head, b_head = params
    B, C, H, W = x_nchw.shape
    HW = H * W

    # ---- one-time parameter folding (tiny, O(C * 1280)) --------------------
    # TODO(synk): this collapse is only valid while the encoder stand-in is a
    # linear 1x1 projection; a real efficientnet_b0 backbone cannot be folded
    # (nor expressed as a single Pallas kernel).
    w_cam = (w_enc @ w_head).reshape(C)                 # (3,)
    w_s = w_cam / std.reshape(C)
    c_bias = -jnp.sum(mean.reshape(C) * w_s)
    wb = jnp.concatenate([w_s, c_bias.reshape(1)]).astype(jnp.float32)   # (4,)

    # ---- tiling / repack to sublane+lane dense layout -----------------------
    hw_pad, hw_tile = _choose_tiling(HW)
    pad = hw_pad - HW
    n_hw = hw_pad // hw_tile
    hw8 = hw_pad // _SUBLANES
    hw8_tile = hw_tile // _SUBLANES

    x3 = x_nchw.reshape(B, C, HW)
    if pad:
        x3 = jnp.pad(x3, ((0, 0), (0, 0), (0, pad)))    # zeros; corrected below
    x4 = x3.reshape(B, C, _SUBLANES, hw8)               # free, order-preserving

    cam4, psums = pl.pallas_call(
        cam_kernel,
        out_shape=(
            jax.ShapeDtypeStruct((B, _SUBLANES, hw8), jnp.float32),
            jax.ShapeDtypeStruct((B, n_hw, 1, 1), jnp.float32),
        ),
        grid_spec=pltpu.PrefetchScalarGridSpec(
            num_scalar_prefetch=0,
            grid=(B, n_hw),
            in_specs=[
                pl.BlockSpec(memory_space=pltpu.MemorySpace.SMEM),
                pl.BlockSpec((1, C, _SUBLANES, hw8_tile), lambda b, t: (b, 0, 0, t)),
            ],
            out_specs=[
                pl.BlockSpec((1, _SUBLANES, hw8_tile), lambda b, t: (b, 0, t)),
                pl.BlockSpec((1, 1, 1, 1), lambda b, t: (b, t, 0, 0)),
            ],
        ),
        compiler_params=pltpu.CompilerParams(
            # independent output blocks per (b, tile) -> fully parallel grid;
            # v7x megacore can split either axis (works even for B=1).
            dimension_semantics=("parallel", "parallel"),
            vmem_limit_bytes=32 * 1024 * 1024,
        ),
        cost_estimate=pl.CostEstimate(
            flops=7 * B * hw_pad,
            transcendentals=0,
            bytes_accessed=(B * C * hw_pad + B * hw_pad + B * n_hw) * 4,
        ),
    )(wb, x4)

    # ---- O(B) epilogue in plain jnp (cheaper than a second Mosaic launch) ---
    sums = jnp.sum(psums.reshape(B, n_hw), axis=1)
    if pad:
        sums = sums - pad * c_bias                      # zero-padded pixels contribute c_bias each
    z = sums / HW + b_head.reshape(())                  # (B,) logits
    prob = jax.nn.sigmoid(z)                            # numerically stable sigmoid
    y = cancer.astype(jnp.float32)
    loss = jnp.mean(jnp.maximum(z, 0.0) - z * y + jnp.log1p(jnp.exp(-jnp.abs(z))))

    cam = cam4.reshape(B, hw_pad)[:, :HW].reshape(B, H, W)
    return {
        "cancer_loss": loss,     # scalar BCE-with-logits
        "cancer": prob,          # (B,) sigmoid probabilities
        "cam": cam,              # (B, H', W') class-activation map
    }


def init_params(key):
    k1, k2, k3 = jax.random.split(key, 3)
    mean = jnp.full((1, 3), 0.5, dtype=jnp.float32)
    std = jnp.full((1, 3), 0.5, dtype=jnp.float32)
    w_enc = jax.random.normal(k1, (3, ENC_CHANNELS), dtype=jnp.float32) * 0.1
    w_head = jax.random.normal(k2, (ENC_CHANNELS, 1), dtype=jnp.float32) * 0.02
    b_head = jax.random.normal(k3, (1, 1), dtype=jnp.float32) * 0.02
    return mean, std, w_enc, w_head, b_head


if __name__ == "__main__":
    key = jax.random.PRNGKey(0)
    kp, kx, ky = jax.random.split(key, 3)

    B, C, H, W = 2, 3, 16, 16
    params = init_params(kp)
    x = jax.random.uniform(kx, (B, C, H, W), dtype=jnp.float32)        # image in [0, 1]
    cancer = jax.random.bernoulli(ky, 0.5, (B,)).astype(jnp.float32)   # binary target

    out = jax.jit(net_forward)(x, cancer, params)
    out = jax.block_until_ready(out)

    # pure-JAX reference of the same (stand-in-encoder) forward pass
    mean, std, w_enc, w_head, b_head = params
    xn = (x - mean.reshape(1, 3, 1, 1)) / std.reshape(1, 3, 1, 1)
    e = jnp.einsum("bchw,ck->bkhw", xn, w_enc)
    z_ref = e.mean(axis=(2, 3)) @ w_head[:, 0] + b_head[0, 0]
    cam_full_ref = jnp.maximum(jnp.einsum("bkhw,k->bhw", e, w_head[:, 0]), 0.0)
    prob_ref = jax.nn.sigmoid(z_ref)
    loss_ref = jnp.mean(
        jnp.maximum(z_ref, 0.0) - z_ref * cancer + jnp.log1p(jnp.exp(-jnp.abs(z_ref)))
    )

    assert out["cancer"].shape == (B,)
    assert out["cam"].shape == (B, H, W)
    assert out["cancer_loss"].shape == ()
    assert bool(jnp.all(jnp.isfinite(out["cancer"])))
    assert bool(jnp.isfinite(out["cancer_loss"]))
    assert bool(jnp.allclose(out["cancer"], prob_ref, atol=1e-4, rtol=1e-4))
    assert bool(jnp.allclose(out["cam"], cam_full_ref, atol=1e-4, rtol=1e-4))
    assert bool(jnp.allclose(out["cancer_loss"], loss_ref, atol=1e-4, rtol=1e-4))
    print("KERNEL_OK")
</pallas_src>

<mosaic_0001>
module attributes {stable_mosaic.version = 11 : i64} {
  func.func @cam_kernel(%arg0: i32, %arg1: i32, %arg2: memref<4xf32, #tpu.memory_space<smem>>, %arg3: memref<1x3x8x128xf32, #tpu.memory_space<vmem>>, %arg4: memref<1x8x128xf32, #tpu.memory_space<vmem>>, %arg5: memref<1x1x1x1xf32, #tpu.memory_space<vmem>>) attributes {dimension_semantics = [#tpu.dimension_semantics<parallel>, #tpu.dimension_semantics<parallel>], iteration_bounds = array<i64: 2, 1>, scalar_prefetch = 0 : i64, scratch_operands = 0 : i64, tpu.core_type = #tpu.core_type<tc>, window_params = [{transform_indices = @transform_0, window_bounds = array<i64: 4>}, {transform_indices = @transform_1, window_bounds = array<i64: 1, 3, 8, 128>}, {transform_indices = @transform_2, window_bounds = array<i64: 1, 8, 128>}, {transform_indices = @transform_3, window_bounds = array<i64: 1, 1, 1, 1>}]} {
    %c0 = arith.constant 0 : index
    %c0_0 = arith.constant 0 : index
    %c0_1 = arith.constant 0 : index
    %c0_2 = arith.constant 0 : index
    %0 = vector.load %arg3[%c0, %c0_0, %c0_1, %c0_2] : memref<1x3x8x128xf32, #tpu.memory_space<vmem>>, vector<1x3x8x128xf32>
    %1 = vector.shape_cast %0 : vector<1x3x8x128xf32> to vector<3x8x128xf32>
    %2 = vector.extract_strided_slice %1 {offsets = [0, 0, 0], sizes = [1, 8, 128], strides = [1, 1, 1]} : vector<3x8x128xf32> to vector<1x8x128xf32>
    %3 = vector.shape_cast %2 : vector<1x8x128xf32> to vector<8x128xf32>
    %c0_3 = arith.constant 0 : index
    %4 = memref.load %arg2[%c0_3] : memref<4xf32, #tpu.memory_space<smem>>
    %5 = vector.broadcast %4 : f32 to vector<8x128xf32>
    %6 = arith.mulf %3, %5 : vector<8x128xf32>
    %7 = vector.extract_strided_slice %1 {offsets = [1, 0, 0], sizes = [1, 8, 128], strides = [1, 1, 1]} : vector<3x8x128xf32> to vector<1x8x128xf32>
    %8 = vector.shape_cast %7 : vector<1x8x128xf32> to vector<8x128xf32>
    %c1 = arith.constant 1 : index
    %9 = memref.load %arg2[%c1] : memref<4xf32, #tpu.memory_space<smem>>
    %10 = vector.broadcast %9 : f32 to vector<8x128xf32>
    %11 = arith.mulf %8, %10 : vector<8x128xf32>
    %12 = arith.addf %6, %11 : vector<8x128xf32>
    %13 = vector.extract_strided_slice %1 {offsets = [2, 0, 0], sizes = [1, 8, 128], strides = [1, 1, 1]} : vector<3x8x128xf32> to vector<1x8x128xf32>
    %14 = vector.shape_cast %13 : vector<1x8x128xf32> to vector<8x128xf32>
    %c2 = arith.constant 2 : index
    %15 = memref.load %arg2[%c2] : memref<4xf32, #tpu.memory_space<smem>>
    %16 = vector.broadcast %15 : f32 to vector<8x128xf32>
    %17 = arith.mulf %14, %16 : vector<8x128xf32>
    %18 = arith.addf %12, %17 : vector<8x128xf32>
    %c3 = arith.constant 3 : index
    %19 = memref.load %arg2[%c3] : memref<4xf32, #tpu.memory_space<smem>>
    %20 = vector.broadcast %19 : f32 to vector<8x128xf32>
    %21 = arith.addf %18, %20 : vector<8x128xf32>
    %cst = arith.constant 0.000000e+00 : f32
    %22 = vector.broadcast %cst : f32 to vector<8x128xf32>
    %23 = arith.maximumf %21, %22 : vector<8x128xf32>
    %24 = vector.shape_cast %23 : vector<8x128xf32> to vector<1x8x128xf32>
    %c0_4 = arith.constant 0 : index
    %c0_5 = arith.constant 0 : index
    %c0_6 = arith.constant 0 : index
    %25 = vector.load %arg4[%c0_4, %c0_5, %c0_6] : memref<1x8x128xf32, #tpu.memory_space<vmem>>, vector<1x8x128xf32>
    tpu.vector_store %arg4[%c0_4, %c0_5, %c0_6], %24 {strides = array<i32>} : memref<1x8x128xf32, #tpu.memory_space<vmem>>, vector<1x8x128xf32>,
    %26 = vector.shape_cast %21 : vector<8x128xf32> to vector<1x8x128xf32>
    %cst_7 = arith.constant dense<0.000000e+00> : vector<1xf32>
    %27 = vector.multi_reduction <add>, %26, %cst_7 [1, 2] : vector<1x8x128xf32> to vector<1xf32>
    %28 = vector.shape_cast %27 : vector<1xf32> to vector<1x1x1xf32>
    %29 = vector.extract %28[0, 0, 0] : f32 from vector<1x1x1xf32>
    %30 = vector.broadcast %29 : f32 to vector<1x1x1x1xf32>
    %c0_8 = arith.constant 0 : index
    %c0_9 = arith.constant 0 : index
    %c0_10 = arith.constant 0 : index
    %c0_11 = arith.constant 0 : index
    %31 = vector.load %arg5[%c0_8, %c0_9, %c0_10, %c0_11] : memref<1x1x1x1xf32, #tpu.memory_space<vmem>>, vector<1x1x1x1xf32>
    tpu.vector_store %arg5[%c0_8, %c0_9, %c0_10, %c0_11], %30 {strides = array<i32>} : memref<1x1x1x1xf32, #tpu.memory_space<vmem>>, vector<1x1x1x1xf32>,
    return
  }
  func.func @transform_0(%arg0: i32, %arg1: i32) -> i32 {
    %c0_i32 = arith.constant 0 : i32
    %c0_i32_0 = arith.constant 0 : i32
    return %c0_i32 : i32
  }
  func.func @transform_1(%arg0: i32, %arg1: i32) -> (i32, i32, i32, i32) {
    %c0_i32 = arith.constant 0 : i32
    %c0_i32_0 = arith.constant 0 : i32
    %c0_i32_1 = arith.constant 0 : i32
    return %arg0, %c0_i32, %c0_i32_0, %arg1 : i32, i32, i32, i32
  }
  func.func @transform_2(%arg0: i32, %arg1: i32) -> (i32, i32, i32) {
    %c0_i32 = arith.constant 0 : i32
    %c0_i32_0 = arith.constant 0 : i32
    return %arg0, %c0_i32, %arg1 : i32, i32, i32
  }
  func.func @transform_3(%arg0: i32, %arg1: i32) -> (i32, i32, i32, i32) {
    %c0_i32 = arith.constant 0 : i32
    %c0_i32_0 = arith.constant 0 : i32
    %c0_i32_1 = arith.constant 0 : i32
    return %arg0, %arg1, %c0_i32, %c0_i32_0 : i32, i32, i32, i32
  }
}

</mosaic_0001>

<bundles_post_ra>
// kernel: net_forward.1
= control target key start
LH: loop header
LB: loop body
LE: loop exit
PB: predicated region body
PF: predicated region fallthrough
CT: control target
= control target key end

     0   :  { %9 = vsyncpa [#allocation3], 0  ;;  %s503_s12 = smov 0   ;;  %s505_s13 = smov 0   ;;  %s570_s0 = inlined_call_operand.vmem [shape: f32[4], index: 0, kind: input, shape index: {}]   ;;  %s571_s1 = inlined_call_operand.vmem [shape: f32[2,3,8,128], index: 1, kind: input, shape index: {}]   ;;  %s572_s2 = inlined_call_operand.vmem [shape: f32[2,8,128], index: 2, kind: output, shape index: {0}]   ;;  %s573_s3 = inlined_call_operand.vmem [shape: f32[2,1,1,1], index: 3, kind: output, shape index: {1}]  }
   0x1   :  { %s507_s14 = smov 0  }
   0x2 LB: > { %s387_s15 = sadd.s32 4294967295, %s480_s14   ;;  %s27_s16 = sadd.s32 1, %s476_s13  ;;  %s480_s14 = sphi %s507_s14, %s15_s14   ;;  %s476_s13 = sphi %s505_s13, %s577_s13   ;;  %s472_s12 = sphi %s503_s12, %s576_s12  }
   0x3   : > { %p29_p0 = scmp.ge.s32.totalorder %s27_s16, 2  ;;  %p389_p1 = scmp.ge.s32.totalorder %s480_s14, 1 }
   0x4   : > { %p137_p2 = scmp.lt.s32.totalorder %s480_s14, 3  ;;  %p528_p4 = scmp.eq.s32.totalorder %s387_s15, 0 }
   0x5   : > { %s579_s16 = smov (%p29_p0, %s27_s16), 0  ;;  %s150_s21 = sshll.u32 %s570_s0, 4  ;;  %s151_s21 = int_to_ptr.vmem [resolvable:$true] %s150_s21 }
   0x6   : > { %p524_p3 = pnand %p389_p1, %p137_p2  ;;  %s439_s22 = scalar_lea.vmem %s151_s21, 16 }
   0x7   : > { %p440_p7 = scmp.ne.s32.totalorder %s151_s21, %s439_s22  ;;  %p447_p11 = scmp.lt.s32.totalorder %s151_s21, %s151_s21 }
   0x8   : > { %p408_p5 = pneg %p524_p3  ;;  %p448_p12 = scmp.lt.s32.totalorder %s439_s22, %s439_s22 }
   0xa   : > { %p409_p6 = pnand %p528_p4, %p408_p5  ;;  %p449_p13 = por %p448_p12, %p447_p11 }
   0xc   : > { %p441_p8 = pneg %p409_p6 }
   0xe   : > { %p442_p9 = pnand %p441_p8, %p440_p7 }
  0x10   : > { %p443_p10 = pneg %p442_p9 }
  0x12   : > { %p450_p0 = pnand %p449_p13, %p443_p10 }
  0x14   : > { %453 = shalt.err (!%p450_p0)
}
  0x15   : > { %s482_s23 = smov [#allocation2]   ;;  %174 = sbr.rel (%p524_p3) target bundleno = 247 (0xf7), region = 28 }
  0x16   : > { %411 = dma.vmem_to_smem (!%p409_p6), %s151_s21, 16, %s482_s23, [#allocation3]  }
  0x1a   : > { %467 = dma.done.wait (%p528_p4), [#allocation3], 16  }
  0x1b   : > { %469 = vsyncadd (%p528_p4), [#allocation3], 4294967280 }
  0x1c   : > { %180 = sfence }
  0x1d   : > { %p210_p1 = scmp.lt.s32.totalorder %s472_s12, 1  ;;  %s234_s24 = sld [smem:[#allocation2]]  ;;  %vm260_vm0 = vcmask 0  }
  0x1e   : > { %s396_s25 = sld [smem:[#allocation2 + $0x1]] }
  0x1f   : > { %s581_s12 = smov (!%p210_p1, %s472_s12), 1  ;;  %s397_s26 = sld [smem:[#allocation2 + $0x2]] }
  0x20   : > { %s401_s27 = smul.u32 24, %s581_s12  ;;  %s398_s28 = sld [smem:[#allocation2 + $0x3]] }
  0x21   : > { %s395_s5 = sshll.u32 %s581_s12, 3  ;;  %s230_s11 = scalar_lea.vmem %s573_s3, %s581_s12 }
  0x22   : > { %s217_s4 = scalar_lea.vmem %s571_s1, %s401_s27  ;;  %s224_s8 = scalar_lea.vmem %s572_s2, %s395_s5 }
  0x23   : > { %v235_v0 = vstv %s234_s24  ;;  %v231_v1 = vld [vmem:[%s217_s4] sm:$0xff]  ;;  %v232_v2 = vld [vmem:[%s217_s4 + $0x8] sm:$0xff]  ;;  %v233_v3 = vld [vmem:[%s217_s4 + $0x10] sm:$0xff] }
  0x24   : > { %v238_v4 = vstv %s396_s25  ;;  %v236_v5 = vmul.f32 %v235_v0, %v231_v1 }
  0x25   : > { %v239_v6 = vmul.f32 %v238_v4, %v232_v2  ;;  %v242_v7 = vstv %s397_s26 }
  0x26   : > { %v243_v9 = vmul.f32 %v242_v7, %v233_v3  ;;  %v246_v10 = vstv %s398_s28 }
  0x27   : > { %v240_v8 = vadd.f32 %v239_v6, %v236_v5 }
  0x29   : > { %v244_v11 = vadd.f32 %v243_v9, %v240_v8 }
  0x2b   : > { %v247_v12 = vadd.f32 %v246_v10, %v244_v11 }
  0x2d   : > { %v248_v13 = vmax.f32 %v247_v12, 0.0  ;;  %250 = vadd.xlane.f32.xlu0 %v247_v12 }
  0x2f   : > { %249 = vst [vmem:[%s224_s8] sm:$0xff] %v248_v13 }
  0xb6   : > { %v251_v14 = vpop.xlane.xlu0 %250 }
  0xb7   : > { %v252_v15 = vrot.slane %v251_v14, 4 }
  0xb9   : > { %v253_v16 = vadd.f32 %v252_v15, %v251_v14 }
  0xbb   : > { %v254_v17 = vrot.slane %v253_v16, 2 }
  0xbd   : > { %v255_v18 = vadd.f32 %v254_v17, %v253_v16 }
  0xbf   : > { %v256_v19 = vrot.slane %v255_v18, 1 }
  0xc1   : > { %v257_v20 = vadd.f32 %v256_v19, %v255_v18 }
  0xc3   : > { %402 = vpush %v257_v20 }
  0xf4   : > { %s403_s15 = spop %402 }
  0xf5   : > { %v259_v21 = vstv %s403_s15 }
  0xf6   : > { %261 = vst.msk [vmem:[%s230_s11] sm:$0x1] %vm260_vm0, %v259_v21 }
  0xf7 PF: > { %s15_s14 = sadd.s32 1, %s480_s14   ;;  %s576_s12 = smov %s476_s13 }
  0xf8   : > { %p12_p2 = scmp.ge.s32.totalorder %s15_s14, 4   ;;  %s577_s13 = smov %s579_s16 }
  0xfa   :  { %14 = sbr.rel (!%p12_p2) target bundleno = 2 (0x2), region = 75 }
  0xff   :  { %305 = vsyncpa [#allocation3], 1 }
 0x100   :  { %307 = vsyncpa [#allocation3 + $0x1], 1 }

</bundles_post_ra>
